<compile_context>
chip_gen: v7x
topology: tpu7x:2x2x1
jax: 0.10.0
libtpu: 0.0.40
codegen_flags: <defaults>
</compile_context>

<pallas_src>
import math
from functools import partial

import jax
import jax.numpy as jnp
from jax.experimental import pallas as pl
from jax.experimental.pallas import tpu as pltpu

H, W = 18, 10
IN_FEATURES = H * W        # 180 — kept unpadded; Mosaic pads the contraction dim internally
HIDDEN = 512
OUT_LANES = 128            # lane-dense output tile (>= out_dim, multiple of 128)
MAX_TILE_B = 1024          # batch tile cap (few-MiB working set << VMEM on v5e/v6e/v7x)


def _round_up(x, m):
    return ((x + m - 1) // m) * m


def _cdiv(a, b):
    return -(-a // b)


def _mlp_kernel(x_ref, w1_ref, b1_ref, w2_ref, b2_ref, o_ref):
    # Fused Linear(180->512) + ReLU + Linear(512->128), one batch tile per grid step.
    x = x_ref[...]                                                       # (TB, 180) compute dtype
    h = jnp.dot(x, w1_ref[...], preferred_element_type=jnp.float32)      # MXU, f32 accumulate
    h = jnp.maximum(h + b1_ref[...], 0.0)                                # f32 bias + ReLU on VPU
    h = h.astype(w2_ref.dtype)                                           # back to MXU input dtype
    y = jnp.dot(h, w2_ref[...], preferred_element_type=jnp.float32)      # MXU, (TB, 128)
    o_ref[...] = (y + b2_ref[...]).astype(o_ref.dtype)                   # unmasked lane-dense store


def _mlp_pallas(x_pad, w1, b1, w2, b2, tile_b):
    b_pad, k = x_pad.shape
    n_pad = w2.shape[1]
    return pl.pallas_call(
        _mlp_kernel,
        out_shape=jax.ShapeDtypeStruct((b_pad, n_pad), x_pad.dtype),
        grid_spec=pltpu.PrefetchScalarGridSpec(
            num_scalar_prefetch=0,
            grid=(b_pad // tile_b,),
            in_specs=[
                pl.BlockSpec((tile_b, k), lambda i: (i, 0)),    # x tile per grid step
                pl.BlockSpec((k, HIDDEN), lambda i: (0, 0)),    # weights: constant index_map
                pl.BlockSpec((1, HIDDEN), lambda i: (0, 0)),    #  -> VMEM-resident across tiles
                pl.BlockSpec((HIDDEN, n_pad), lambda i: (0, 0)),
                pl.BlockSpec((1, n_pad), lambda i: (0, 0)),
            ],
            out_specs=pl.BlockSpec((tile_b, n_pad), lambda i: (i, 0)),
        ),
        compiler_params=pltpu.CompilerParams(
            dimension_semantics=("parallel",),       # batch tiles shard across v7x's 2 TCs
            vmem_limit_bytes=32 * 1024 * 1024,
        ),
    )(x_pad, w1, b1, w2, b2)


def _init_linear(key, fan_in, fan_out, pad_out, dtype):
    # PyTorch nn.Linear default init: U(-1/sqrt(fan_in), 1/sqrt(fan_in)).
    kw, kb = jax.random.split(key)
    bound = 1.0 / math.sqrt(fan_in)
    # Stored as (fan_in, fan_out) == transpose of PyTorch's (out, in) layout.
    w = jax.random.uniform(kw, (fan_in, fan_out), jnp.float32, -bound, bound)
    b = jax.random.uniform(kb, (1, fan_out), jnp.float32, -bound, bound)
    # Only the output side is padded (lane-dense stores); weights go to the
    # compute dtype, biases stay f32 so the epilogue is f32 on all generations.
    w = jnp.pad(w, ((0, 0), (0, pad_out - fan_out))).astype(dtype)
    b = jnp.pad(b, ((0, 0), (0, pad_out - fan_out)))
    return w, b


@partial(jax.jit, static_argnames=("out_dim",))
def _forward(x, params, out_dim):
    w1, b1, w2, b2 = params
    B = x.shape[0]
    x_flat = x.reshape(B, IN_FEATURES).astype(w1.dtype)     # nn.Flatten + compute-dtype cast

    # Minimal batch padding: round to full sublane groups, split into tiles with
    # ceil-div (<= 7 garbage rows of pad per tile), and keep >= 2 tiles once
    # B >= 16 so the "parallel" grid can use both v7x TensorCores.
    b_pad = _round_up(max(B, 8), 8)
    n_tiles = _cdiv(b_pad, MAX_TILE_B)
    if b_pad >= 16:
        n_tiles = max(n_tiles, 2)
    tile_b = _round_up(_cdiv(b_pad, n_tiles), 8)
    b_pad = n_tiles * tile_b

    # Padded rows are zeros -> well-defined (bias/ReLU) garbage that gets sliced off.
    x_pad = jnp.pad(x_flat, ((0, b_pad - B), (0, 0)))
    y_pad = _mlp_pallas(x_pad, w1, b1, w2, b2, tile_b)
    return y_pad[:B, :out_dim].astype(jnp.float32)


class AgentNetPallas:
    """Pallas port of AgentNet: Flatten -> Linear(180,512) -> ReLU -> Linear(512,out)."""

    def __init__(self, input_dim, output_dim, key, compute_dtype=jnp.bfloat16):
        h, w = input_dim
        if h != 18:
            raise ValueError(f'Expecting input height: 18, got: {h}')
        if w != 10:
            raise ValueError(f'Expecting input width: 10, got: {w}')
        if output_dim > OUT_LANES:
            raise ValueError(f'output_dim must be <= {OUT_LANES}, got: {output_dim}')
        self.output_dim = output_dim
        self.compute_dtype = compute_dtype
        k1, k2 = jax.random.split(key)
        w1, b1 = _init_linear(k1, IN_FEATURES, HIDDEN, HIDDEN, compute_dtype)
        w2, b2 = _init_linear(k2, HIDDEN, output_dim, OUT_LANES, compute_dtype)
        self.online = (w1, b1, w2, b2)
        # target.load_state_dict(online.state_dict()) -> identical, frozen copy.
        self.target = tuple(jnp.array(p) for p in self.online)

    def __call__(self, x, model):
        # x: (B, 18, 10) float32
        if model == 'online':
            params = self.online
        elif model == 'target':
            params = self.target
        else:
            return None  # matches PyTorch forward's implicit None for unknown model
        return _forward(x, params, self.output_dim)


if __name__ == "__main__":
    key = jax.random.PRNGKey(0)
    k_param, k_input = jax.random.split(key)

    batch = 2
    output_dim = 8
    x = jax.random.normal(k_input, (batch, H, W), jnp.float32)

    def ref_fwd(params, xin):
        w1, b1, w2, b2 = params
        xf = xin.reshape(xin.shape[0], -1).astype(jnp.float32)
        h = jnp.maximum(xf @ w1.astype(jnp.float32)[:, :HIDDEN] + b1[:, :HIDDEN], 0.0)
        return h @ w2.astype(jnp.float32)[:, :output_dim] + b2[:, :output_dim]

    # --- Exactness path: compute_dtype=f32, tight tolerance vs plain-JAX reference. ---
    net32 = AgentNetPallas((H, W), output_dim, k_param, compute_dtype=jnp.float32)
    y_online = jax.block_until_ready(net32(x, 'online'))
    y_target = jax.block_until_ready(net32(x, 'target'))
    assert y_online.shape == (batch, output_dim)
    assert y_target.shape == (batch, output_dim)
    ref = ref_fwd(net32.online, x)
    assert jnp.allclose(y_online, ref, atol=1e-5, rtol=1e-5)
    assert jnp.allclose(y_target, ref, atol=1e-5, rtol=1e-5)

    # Ragged multi-tile batch: exercises >= 2 parallel tiles and minimal batch pad.
    big_b = 1027
    xb = jax.random.normal(jax.random.PRNGKey(1), (big_b, H, W), jnp.float32)
    yb = jax.block_until_ready(net32(xb, 'online'))
    refb = ref_fwd(net32.online, xb)
    assert yb.shape == (big_b, output_dim)
    assert jnp.allclose(yb, refb, atol=1e-4, rtol=1e-5)

    # --- Default bf16 throughput path (v6e/v7x): loose tolerance vs f32 reference. ---
    net_bf16 = AgentNetPallas((H, W), output_dim, k_param)  # compute_dtype=bf16 default
    yb16 = jax.block_until_ready(net_bf16(x, 'online'))
    ref16 = ref_fwd(net_bf16.online, x)
    assert yb16.shape == (batch, output_dim)
    assert jnp.allclose(yb16, ref16, atol=5e-2, rtol=5e-2)

    print("KERNEL_OK")
</pallas_src>

<mosaic_0001>
module attributes {stable_mosaic.version = 11 : i64} {
  func.func @_mlp_kernel(%arg0: i32, %arg1: memref<8x180xf32, #tpu.memory_space<vmem>>, %arg2: memref<180x512xf32, #tpu.memory_space<vmem>>, %arg3: memref<1x512xf32, #tpu.memory_space<vmem>>, %arg4: memref<512x128xf32, #tpu.memory_space<vmem>>, %arg5: memref<1x128xf32, #tpu.memory_space<vmem>>, %arg6: memref<8x128xf32, #tpu.memory_space<vmem>>) attributes {dimension_semantics = [#tpu.dimension_semantics<parallel>], iteration_bounds = array<i64: 1>, scalar_prefetch = 0 : i64, scratch_operands = 0 : i64, tpu.core_type = #tpu.core_type<tc>, window_params = [{transform_indices = @transform_0, window_bounds = array<i64: 8, 180>}, {pipeline_mode = #tpu.pipeline_mode<synchronous>, transform_indices = @transform_1, window_bounds = array<i64: 180, 512>}, {pipeline_mode = #tpu.pipeline_mode<synchronous>, transform_indices = @transform_2, window_bounds = array<i64: 1, 512>}, {pipeline_mode = #tpu.pipeline_mode<synchronous>, transform_indices = @transform_3, window_bounds = array<i64: 512, 128>}, {pipeline_mode = #tpu.pipeline_mode<synchronous>, transform_indices = @transform_4, window_bounds = array<i64: 1, 128>}, {transform_indices = @transform_5, window_bounds = array<i64: 8, 128>}]} {
    %c0 = arith.constant 0 : index
    %c0_0 = arith.constant 0 : index
    %0 = vector.load %arg1[%c0, %c0_0] : memref<8x180xf32, #tpu.memory_space<vmem>>, vector<8x180xf32>
    %c0_1 = arith.constant 0 : index
    %c0_2 = arith.constant 0 : index
    %1 = vector.load %arg2[%c0_1, %c0_2] : memref<180x512xf32, #tpu.memory_space<vmem>>, vector<180x512xf32>
    %cst = arith.constant dense<0.000000e+00> : vector<8x512xf32>
    %2 = tpu.matmul %0, %1, %cst {dimension_numbers = #tpu.dot_dimension_numbers<[1], [0], [0], [1], [0, 0, 1, 1], [], []>} : vector<8x180xf32>, vector<180x512xf32>, vector<8x512xf32> -> vector<8x512xf32>
    %c0_3 = arith.constant 0 : index
    %c0_4 = arith.constant 0 : index
    %3 = vector.load %arg3[%c0_3, %c0_4] : memref<1x512xf32, #tpu.memory_space<vmem>>, vector<1x512xf32>
    %4 = vector.broadcast %3 : vector<1x512xf32> to vector<8x512xf32>
    %5 = arith.addf %2, %4 : vector<8x512xf32>
    %cst_5 = arith.constant 0.000000e+00 : f32
    %6 = vector.broadcast %cst_5 : f32 to vector<8x512xf32>
    %7 = arith.maximumf %5, %6 : vector<8x512xf32>
    %c0_6 = arith.constant 0 : index
    %c0_7 = arith.constant 0 : index
    %8 = vector.load %arg4[%c0_6, %c0_7] : memref<512x128xf32, #tpu.memory_space<vmem>>, vector<512x128xf32>
    %cst_8 = arith.constant dense<0.000000e+00> : vector<8x128xf32>
    %9 = tpu.matmul %7, %8, %cst_8 {dimension_numbers = #tpu.dot_dimension_numbers<[1], [0], [0], [1], [0, 0, 1, 1], [], []>} : vector<8x512xf32>, vector<512x128xf32>, vector<8x128xf32> -> vector<8x128xf32>
    %c0_9 = arith.constant 0 : index
    %c0_10 = arith.constant 0 : index
    %10 = vector.load %arg5[%c0_9, %c0_10] : memref<1x128xf32, #tpu.memory_space<vmem>>, vector<1x128xf32>
    %11 = vector.broadcast %10 : vector<1x128xf32> to vector<8x128xf32>
    %12 = arith.addf %9, %11 : vector<8x128xf32>
    %c0_11 = arith.constant 0 : index
    %c0_12 = arith.constant 0 : index
    %13 = vector.load %arg6[%c0_11, %c0_12] : memref<8x128xf32, #tpu.memory_space<vmem>>, vector<8x128xf32>
    tpu.vector_store %arg6[%c0_11, %c0_12], %12 {strides = array<i32>} : memref<8x128xf32, #tpu.memory_space<vmem>>, vector<8x128xf32>,
    return
  }
  func.func @transform_0(%arg0: i32) -> (i32, i32) {
    %c0_i32 = arith.constant 0 : i32
    %c0_i32_0 = arith.constant 0 : i32
    return %arg0, %c0_i32 : i32, i32
  }
  func.func @transform_1(%arg0: i32) -> (i32, i32) {
    %c0_i32 = arith.constant 0 : i32
    %c0_i32_0 = arith.constant 0 : i32
    %c0_i32_1 = arith.constant 0 : i32
    return %c0_i32, %c0_i32_0 : i32, i32
  }
  func.func @transform_2(%arg0: i32) -> (i32, i32) {
    %c0_i32 = arith.constant 0 : i32
    %c0_i32_0 = arith.constant 0 : i32
    %c0_i32_1 = arith.constant 0 : i32
    return %c0_i32, %c0_i32_0 : i32, i32
  }
  func.func @transform_3(%arg0: i32) -> (i32, i32) {
    %c0_i32 = arith.constant 0 : i32
    %c0_i32_0 = arith.constant 0 : i32
    %c0_i32_1 = arith.constant 0 : i32
    return %c0_i32, %c0_i32_0 : i32, i32
  }
  func.func @transform_4(%arg0: i32) -> (i32, i32) {
    %c0_i32 = arith.constant 0 : i32
    %c0_i32_0 = arith.constant 0 : i32
    %c0_i32_1 = arith.constant 0 : i32
    return %c0_i32, %c0_i32_0 : i32, i32
  }
  func.func @transform_5(%arg0: i32) -> (i32, i32) {
    %c0_i32 = arith.constant 0 : i32
    %c0_i32_0 = arith.constant 0 : i32
    return %arg0, %c0_i32 : i32, i32
  }
}

</mosaic_0001>

<bundles_post_ra>
// kernel: _forward.1
= control target key start
LH: loop header
LB: loop body
LE: loop exit
PB: predicated region body
PF: predicated region fallthrough
CT: control target
= control target key end

     0   :  { %10 = vsyncpa [#allocation3], 0  ;;  %s909_s0 = inlined_call_operand.vmem [shape: f32[8,180], index: 0, kind: input, shape index: {}]   ;;  %s910_s1 = inlined_call_operand.hbm [shape: f32[180,512], index: 1, kind: input, shape index: {}]   ;;  %s911_s2 = inlined_call_operand.vmem [shape: f32[1,512], index: 2, kind: input, shape index: {}]   ;;  %s912_s3 = inlined_call_operand.hbm [shape: f32[512,128], index: 3, kind: input, shape index: {}]   ;;  %s913_s4 = inlined_call_operand.vmem [shape: f32[1,128], index: 4, kind: input, shape index: {}]   ;;  %s914_s5 = inlined_call_operand.vmem [shape: f32[8,128], index: 5, kind: output, shape index: {}]  }
   0x1   :  { %11 = vsyncpa [#allocation5], 0  ;;  %s828_s18 = smov [#allocation2]   ;;  %s780_s22 = scalar_lea.hbm %s910_s1, 11776 }
   0x2   :  { %s19_s19 = sshll.u32 %s828_s18, 4  ;;  %p781_p0 = scmp.ne.s32.totalorder %s910_s1, %s780_s22  ;;  %s20_s19 = int_to_ptr.vmem [resolvable:$true] %s19_s19 }
   0x3   :  { %p784_p1 = scmp.lt.u32.totalorder %s780_s22, %s910_s1 }
   0x5   :  { %p786_p2 = pnand %p784_p1, %p781_p0 }
   0x7   :  { %789 = shalt.err (!%p786_p2)
}
   0x8   :  { %s790_s27 = scalar_lea.vmem %s20_s19, 11776  ;;  %p795_p4 = scmp.lt.s32.totalorder %s20_s19, %s20_s19 }
   0x9   :  { %p791_p3 = scmp.ne.s32.totalorder %s20_s19, %s790_s27  ;;  %p796_p5 = scmp.lt.s32.totalorder %s790_s27, %s790_s27 }
   0xb   :  { %p797_p6 = por %p796_p5, %p795_p4 }
   0xd   :  { %p798_p7 = pnand %p797_p6, %p791_p3 }
   0xf   :  { %801 = shalt.err (!%p798_p7)
}
  0x10   :  { %s829_s28 = smov 512   ;;  %s830_s29 = smov 32  }
  0x11   :  { %25 = dma.hbm_to_vmem [thread:$0]  %s910_s1, 11776, %s20_s19, [#allocation3], %s829_s28, %s829_s28, %s830_s29  }
  0x12   :  { %s831_s7 = smov [#allocation4]   ;;  %s802_s11 = scalar_lea.hbm %s912_s3, 8192 }
  0x13   :  { %s33_s8 = sshll.u32 %s831_s7, 4  ;;  %p803_p8 = scmp.ne.s32.totalorder %s912_s3, %s802_s11  ;;  %s34_s8 = int_to_ptr.vmem [resolvable:$true] %s33_s8 }
  0x14   :  { %p806_p9 = scmp.lt.u32.totalorder %s802_s11, %s912_s3 }
  0x16   :  { %p808_p10 = pnand %p806_p9, %p803_p8 }
  0x18   :  { %811 = shalt.err (!%p808_p10)
}
  0x19   :  { %s812_s16 = scalar_lea.vmem %s34_s8, 8192  ;;  %p817_p12 = scmp.lt.s32.totalorder %s34_s8, %s34_s8 }
  0x1a   :  { %p813_p11 = scmp.ne.s32.totalorder %s34_s8, %s812_s16  ;;  %p818_p13 = scmp.lt.s32.totalorder %s812_s16, %s812_s16 }
  0x1c   :  { %p819_p0 = por %p818_p13, %p817_p12 }
  0x1e   :  { %p820_p1 = pnand %p819_p0, %p813_p11 }
  0x20   :  { %823 = shalt.err (!%p820_p1)
}
  0x21   :  { %s832_s1 = smov 128   ;;  %s833_s17 = smov 8  }
  0x22   :  { %39 = dma.hbm_to_vmem [thread:$0]  %s912_s3, 8192, %s34_s8, [#allocation5], %s832_s1, %s832_s1, %s833_s17  }
  0x23   :  { %824 = dma.done.wait [#allocation3], 11776  }
  0x24   :  { %825 = vsyncadd [#allocation3], 4294955520 }
  0x25   :  { %826 = dma.done.wait [#allocation5], 8192  }
  0x26   :  { %827 = vsyncadd [#allocation5], 4294959104  ;;  %v51_v0 = vld [vmem:[#allocation2 + $0x8] sm:$0xff]  ;;  %v53_v2 = vld [vmem:[#allocation2 + $0x18] sm:$0xff]  ;;  %vm164_vm0 = vcmask 424960   ;;  %vm168_vm1 = vcmask 1043456  }
  0x27   :  { %v55_v1 = vld [vmem:[#allocation2 + $0x28] sm:$0xff]  ;;  %v57_v4 = vld [vmem:[#allocation2 + $0x38] sm:$0xff]  ;;  %v50_v5 = vld [vmem:[#allocation2] sm:$0xff] }
  0x28   :  { %v622_v3 = vpack.c.bf16 %v55_v1, %v51_v0  ;;  %v54_v6 = vld [vmem:[#allocation2 + $0x20] sm:$0xff]  ;;  %v666_v7 = vpack.c.bf16 %v57_v4, %v53_v2  ;;  %v52_v9 = vld [vmem:[#allocation2 + $0x10] sm:$0xff]  ;;  %v59_v11 = vld [vmem:[#allocation2 + $0x48] sm:$0xff] }
  0x29   :  { %v624_v8 = vpack.c.bf16 %v54_v6, %v50_v5  ;;  %v56_v10 = vld [vmem:[#allocation2 + $0x30] sm:$0xff]  ;;  %v63_v13 = vld [vmem:[#allocation2 + $0x68] sm:$0xff]  ;;  %v61_v14 = vld [vmem:[#allocation2 + $0x58] sm:$0xff] }
  0x2a   :  { %623 = vmatprep.subr.bf16.mxu0 %v622_v3  ;;  %v668_v12 = vpack.c.bf16 %v56_v10, %v52_v9  ;;  %v65_v15 = vld [vmem:[#allocation2 + $0x78] sm:$0xff]  ;;  %667 = vmatprep.subr.bf16.mxu1 %v666_v7  ;;  %v626_v16 = vpack.c.bf16 %v63_v13, %v59_v11  ;;  %v58_v18 = vld [vmem:[#allocation2 + $0x40] sm:$0xff]  ;;  %v60_v20 = vld [vmem:[#allocation2 + $0x50] sm:$0xff] }
  0x2b   :  { %625 = vmatpush1.bf16.msra.mxu0 %v624_v8  ;;  %v670_v17 = vpack.c.bf16 %v65_v15, %v61_v14  ;;  %v62_v19 = vld [vmem:[#allocation2 + $0x60] sm:$0xff]  ;;  %v64_v22 = vld [vmem:[#allocation2 + $0x70] sm:$0xff]  ;;  %v67_v23 = vld [vmem:[#allocation2 + $0x88] sm:$0xff] }
  0x2c   :  { %669 = vmatpush1.bf16.msra.mxu1 %v668_v12  ;;  %v628_v21 = vpack.c.bf16 %v62_v19, %v58_v18  ;;  %v71_v24 = vld [vmem:[#allocation2 + $0xa8] sm:$0xff]  ;;  %627 = vmatprep.subr.bf16.mxu0 %v626_v16  ;;  %v672_v25 = vpack.c.bf16 %v64_v22, %v60_v20  ;;  %v69_v27 = vld [vmem:[#allocation2 + $0x98] sm:$0xff]  ;;  %v66_v29 = vld [vmem:[#allocation2 + $0x80] sm:$0xff] }
  0x2d   :  { %671 = vmatprep.subr.bf16.mxu1 %v670_v17  ;;  %v630_v26 = vpack.c.bf16 %v71_v24, %v67_v23  ;;  %v73_v28 = vld [vmem:[#allocation2 + $0xb8] sm:$0xff]  ;;  %v70_v31 = vld [vmem:[#allocation2 + $0xa0] sm:$0xff]  ;;  %v68_v32 = vld [vmem:[#allocation2 + $0x90] sm:$0xff] }
  0x2e   :  { %v674_v30 = vpack.c.bf16 %v73_v28, %v69_v27  ;;  %v72_v33 = vld [vmem:[#allocation2 + $0xb0] sm:$0xff]  ;;  %v632_v34 = vpack.c.bf16 %v70_v31, %v66_v29  ;;  %v75_v35 = vld [vmem:[#allocation2 + $0xc8] sm:$0xff]  ;;  %v77_v37 = vld [vmem:[#allocation2 + $0xd8] sm:$0xff] }
  0x2f   :  { %629 = vmatpush1.bf16.msra.mxu0 %v628_v21  ;;  %v79_v36 = vld [vmem:[#allocation2 + $0xe8] sm:$0xff]  ;;  %v676_v38 = vpack.c.bf16 %v72_v33, %v68_v32  ;;  %v81_v40 = vld [vmem:[#allocation2 + $0xf8] sm:$0xff]  ;;  %v74_v41 = vld [vmem:[#allocation2 + $0xc0] sm:$0xff] }
  0x30   :  { %673 = vmatpush1.bf16.msra.mxu1 %v672_v25  ;;  %631 = vmatprep.subr.bf16.mxu0 %v630_v26  ;;  %v634_v39 = vpack.c.bf16 %v79_v36, %v75_v35  ;;  %v78_v42 = vld [vmem:[#allocation2 + $0xe0] sm:$0xff]  ;;  %v678_v43 = vpack.c.bf16 %v81_v40, %v77_v37  ;;  %v76_v44 = vld [vmem:[#allocation2 + $0xd0] sm:$0xff]  ;;  %v83_v46 = vld [vmem:[#allocation2 + $0x108] sm:$0xff] }
  0x31   :  { %675 = vmatprep.subr.bf16.mxu1 %v674_v30  ;;  %v80_v45 = vld [vmem:[#allocation2 + $0xf0] sm:$0xff]  ;;  %v87_v47 = vld [vmem:[#allocation2 + $0x128] sm:$0xff]  ;;  %v85_v48 = vld [vmem:[#allocation2 + $0x118] sm:$0xff]  ;;  %v636_v50 = vpack.c.bf16 %v78_v42, %v74_v41 }
  0x32   :  { %v89_v49 = vld [vmem:[#allocation2 + $0x138] sm:$0xff]  ;;  %v680_v51 = vpack.c.bf16 %v80_v45, %v76_v44  ;;  %v638_v52 = vpack.c.bf16 %v87_v47, %v83_v46  ;;  %v82_v53 = vld [vmem:[#allocation2 + $0x100] sm:$0xff]  ;;  %v84_v55 = vld [vmem:[#allocation2 + $0x110] sm:$0xff] }
  0x33   :  { %633 = vmatpush1.bf16.msra.mxu0 %v632_v34  ;;  %v86_v54 = vld [vmem:[#allocation2 + $0x120] sm:$0xff]  ;;  %v682_v56 = vpack.c.bf16 %v89_v49, %v85_v48  ;;  %v88_v57 = vld [vmem:[#allocation2 + $0x130] sm:$0xff]  ;;  %v91_v58 = vld [vmem:[#allocation2 + $0x148] sm:$0xff] }
  0x34   :  { %677 = vmatpush1.bf16.msra.mxu1 %v676_v38  ;;  %635 = vmatprep.subr.bf16.mxu0 %v634_v39  ;;  %v95_v59 = vld [vmem:[#allocation2 + $0x168] sm:$0xff]  ;;  %v93_v60 = vld [vmem:[#allocation2 + $0x158] sm:$0xff]  ;;  %v640_v62 = vpack.c.bf16 %v86_v54, %v82_v53  ;;  %v684_v63 = vpack.c.bf16 %v88_v57, %v84_v55  ;;  %v90_v1 = vld [vmem:[#allocation2 + $0x140] sm:$0xff] }
  0x35   :  { %679 = vmatprep.subr.bf16.mxu1 %v678_v43  ;;  %v97_v61 = vld [vmem:[#allocation2 + $0x178] sm:$0xff]  ;;  %v642_v0 = vpack.c.bf16 %v95_v59, %v91_v58  ;;  %v94_v2 = vld [vmem:[#allocation2 + $0x160] sm:$0xff]  ;;  %v92_v3 = vld [vmem:[#allocation2 + $0x150] sm:$0xff] }
  0x36   :  { %v686_v4 = vpack.c.bf16 %v97_v61, %v93_v60  ;;  %v96_v5 = vld [vmem:[#allocation2 + $0x170] sm:$0xff]  ;;  %v99_v6 = vld [vmem:[#allocation2 + $0x188] sm:$0xff]  ;;  %v101_v8 = vld [vmem:[#allocation2 + $0x198] sm:$0xff]  ;;  %v644_v10 = vpack.c.bf16 %v94_v2, %v90_v1 }
  0x37   :  { %637 = vmatpush1.bf16.msra.mxu0 %v636_v50  ;;  %v103_v7 = vld [vmem:[#allocation2 + $0x1a8] sm:$0xff]  ;;  %v105_v9 = vld [vmem:[#allocation2 + $0x1b8] sm:$0xff]  ;;  %v688_v11 = vpack.c.bf16 %v96_v5, %v92_v3  ;;  %v98_v13 = vld [vmem:[#allocation2 + $0x180] sm:$0xff] }
  0x38   :  { %681 = vmatpush1.bf16.msra.mxu1 %v680_v51  ;;  %639 = vmatprep.subr.bf16.mxu0 %v638_v52  ;;  %v646_v12 = vpack.c.bf16 %v103_v7, %v99_v6  ;;  %v102_v14 = vld [vmem:[#allocation2 + $0x1a0] sm:$0xff]  ;;  %v100_v15 = vld [vmem:[#allocation2 + $0x190] sm:$0xff]  ;;  %v690_v16 = vpack.c.bf16 %v105_v9, %v101_v8  ;;  %v107_v18 = vld [vmem:[#allocation2 + $0x1c8] sm:$0xff] }
  0x39   :  { %683 = vmatprep.subr.bf16.mxu1 %v682_v56  ;;  %v104_v17 = vld [vmem:[#allocation2 + $0x1b0] sm:$0xff]  ;;  %v111_v19 = vld [vmem:[#allocation2 + $0x1e8] sm:$0xff]  ;;  %v109_v20 = vld [vmem:[#allocation2 + $0x1d8] sm:$0xff]  ;;  %v648_v22 = vpack.c.bf16 %v102_v14, %v98_v13 }
  0x3a   :  { %v113_v21 = vld [vmem:[#allocation2 + $0x1f8] sm:$0xff]  ;;  %v692_v23 = vpack.c.bf16 %v104_v17, %v100_v15  ;;  %v650_v24 = vpack.c.bf16 %v111_v19, %v107_v18  ;;  %v106_v25 = vld [vmem:[#allocation2 + $0x1c0] sm:$0xff]  ;;  %v108_v27 = vld [vmem:[#allocation2 + $0x1d0] sm:$0xff] }
  0x3b   :  { %641 = vmatpush1.bf16.msra.mxu0 %v640_v62  ;;  %v110_v26 = vld [vmem:[#allocation2 + $0x1e0] sm:$0xff]  ;;  %v694_v28 = vpack.c.bf16 %v113_v21, %v109_v20  ;;  %v112_v29 = vld [vmem:[#allocation2 + $0x1f0] sm:$0xff]  ;;  %v115_v30 = vld [vmem:[#allocation2 + $0x208] sm:$0xff] }
  0x3c   :  { %685 = vmatpush1.bf16.msra.mxu1 %v684_v63  ;;  %643 = vmatprep.subr.bf16.mxu0 %v642_v0  ;;  %v119_v31 = vld [vmem:[#allocation2 + $0x228] sm:$0xff]  ;;  %v117_v32 = vld [vmem:[#allocation2 + $0x218] sm:$0xff]  ;;  %v652_v34 = vpack.c.bf16 %v110_v26, %v106_v25  ;;  %v114_v35 = vld [vmem:[#allocation2 + $0x200] sm:$0xff]  ;;  %v696_v36 = vpack.c.bf16 %v112_v29, %v108_v27 }
  0x3d   :  { %687 = vmatprep.subr.bf16.mxu1 %v686_v4  ;;  %v121_v33 = vld [vmem:[#allocation2 + $0x238] sm:$0xff]  ;;  %v654_v37 = vpack.c.bf16 %v119_v31, %v115_v30  ;;  %v118_v38 = vld [vmem:[#allocation2 + $0x220] sm:$0xff]  ;;  %v116_v39 = vld [vmem:[#allocation2 + $0x210] sm:$0xff] }
  0x3e   :  { %v120_v40 = vld [vmem:[#allocation2 + $0x230] sm:$0xff]  ;;  %v698_v41 = vpack.c.bf16 %v121_v33, %v117_v32  ;;  %v123_v42 = vld [vmem:[#allocation2 + $0x248] sm:$0xff]  ;;  %v125_v45 = vld [vmem:[#allocation2 + $0x258] sm:$0xff]  ;;  %v656_v47 = vpack.c.bf16 %v118_v38, %v114_v35 }
  0x3f   :  { %645 = vmatpush1.bf16.msra.mxu0 %v644_v10  ;;  %v127_v43 = vld [vmem:[#allocation2 + $0x268] sm:$0xff]  ;;  %v129_v46 = vld [vmem:[#allocation2 + $0x278] sm:$0xff]  ;;  %v700_v48 = vpack.c.bf16 %v120_v40, %v116_v39  ;;  %v122_v50 = vld [vmem:[#allocation2 + $0x240] sm:$0xff] }
  0x40   :  { %689 = vmatpush1.bf16.msra.mxu1 %v688_v11  ;;  %647 = vmatprep.subr.bf16.mxu0 %v646_v12  ;;  %v49_v44 = vld [vmem:[%s909_s0 + $0x8] sm:$0xff]  ;;  %v658_v49 = vpack.c.bf16 %v127_v43, %v123_v42  ;;  %v126_v51 = vld [vmem:[#allocation2 + $0x260] sm:$0xff]  ;;  %v124_v52 = vld [vmem:[#allocation2 + $0x250] sm:$0xff]  ;;  %v702_v53 = vpack.c.bf16 %v129_v46, %v125_v45 }
  0x41   :  { %691 = vmatprep.subr.bf16.mxu1 %v690_v16  ;;  %547 = vmatprep.mubr.msk.f32.mxu0 %vm164_vm0, %v49_v44  ;;  %v128_v54 = vld [vmem:[#allocation2 + $0x270] sm:$0xff]  ;;  %v131_v55 = vld [vmem:[#allocation2 + $0x288] sm:$0xff]  ;;  %v133_v57 = vld [vmem:[#allocation2 + $0x298] sm:$0xff]  ;;  %v660_v59 = vpack.c.bf16 %v126_v51, %v122_v50 }
  0x42   :  { %550 = vmatprep.mubr.msk.f32.mxu1 %vm164_vm0, %v49_v44  ;;  %v135_v56 = vld [vmem:[#allocation2 + $0x2a8] sm:$0xff]  ;;  %v137_v58 = vld [vmem:[#allocation2 + $0x2b8] sm:$0xff]  ;;  %v704_v60 = vpack.c.bf16 %v128_v54, %v124_v52  ;;  %v130_v62 = vld [vmem:[#allocation2 + $0x280] sm:$0xff] }
  0x43   :  { %649 = vmatpush1.bf16.msra.mxu0 %v648_v22  ;;  %v662_v61 = vpack.c.bf16 %v135_v56, %v131_v55  ;;  %v134_v63 = vld [vmem:[#allocation2 + $0x2a0] sm:$0xff]  ;;  %v706_v0 = vpack.c.bf16 %v137_v58, %v133_v57  ;;  %v132_v1 = vld [vmem:[#allocation2 + $0x290] sm:$0xff]  ;;  %v139_v5 = vld [vmem:[#allocation2 + $0x2c8] sm:$0xf] }
  0x44   :  { %693 = vmatpush1.bf16.msra.mxu1 %v692_v23  ;;  %651 = vmatprep.subr.bf16.mxu0 %v650_v24  ;;  %v136_v2 = vld [vmem:[#allocation2 + $0x2b0] sm:$0xff]  ;;  %v664_v3 = vpack.c.bf16 %v134_v63, %v130_v62  ;;  %v141_v6 = vld [vmem:[#allocation2 + $0x2d8] sm:$0xf]  ;;  %v343_v7 = vld [vmem:[#allocation4 + $0x80] sm:$0xff] }
  0x45   :  { %695 = vmatprep.subr.bf16.mxu1 %v694_v28  ;;  %v708_v4 = vpack.c.bf16 %v136_v2, %v132_v1  ;;  %v138_v8 = vld [vmem:[#allocation2 + $0x2c0] sm:$0xf]  ;;  %v344_v9 = vld [vmem:[#allocation4 + $0x88] sm:$0xff]  ;;  %v140_v12 = vld [vmem:[#allocation2 + $0x2d0] sm:$0xf] }
  0x46   :  { %v375_v10 = vld [vmem:[#allocation4 + $0x180] sm:$0xff]  ;;  %v376_v11 = vld [vmem:[#allocation4 + $0x188] sm:$0xff]  ;;  %v345_v17 = vld [vmem:[#allocation4 + $0x90] sm:$0xff]  ;;  %v710_v20 = vpack.c.bf16 %v344_v9, %v343_v7 }
  0x47   :  { %653 = vmatpush1.bf16.msra.mxu0 %v652_v34  ;;  %v327_v13 = vld [vmem:[#allocation4] sm:$0xff]  ;;  %v328_v14 = vld [vmem:[#allocation4 + $0x8] sm:$0xff]  ;;  %v346_v18 = vld [vmem:[#allocation4 + $0x98] sm:$0xff]  ;;  %v742_v23 = vpack.c.bf16 %v376_v11, %v375_v10 }
  0x48   :  { %697 = vmatpush1.bf16.msra.mxu1 %v696_v36  ;;  %655 = vmatprep.subr.bf16.mxu0 %v654_v37  ;;  %v359_v15 = vld [vmem:[#allocation4 + $0x100] sm:$0xff]  ;;  %v360_v16 = vld [vmem:[#allocation4 + $0x108] sm:$0xff]  ;;  %v377_v21 = vld [vmem:[#allocation4 + $0x190] sm:$0xff]  ;;  %v712_v24 = vpack.c.bf16 %v328_v14, %v327_v13  ;;  %v714_v26 = vpack.c.bf16 %v346_v18, %v345_v17 }
  0x49   :  { %699 = vmatprep.subr.bf16.mxu1 %v698_v41  ;;  %v48_v19 = vld [vmem:[%s909_s0] sm:$0xff]  ;;  %v378_v22 = vld [vmem:[#allocation4 + $0x198] sm:$0xff]  ;;  %v744_v25 = vpack.c.bf16 %v360_v16, %v359_v15  ;;  %v329_v27 = vld [vmem:[#allocation4 + $0x10] sm:$0xff] }
  0x4a   :  { %v330_v28 = vld [vmem:[#allocation4 + $0x18] sm:$0xff]  ;;  %v361_v29 = vld [vmem:[#allocation4 + $0x110] sm:$0xff]  ;;  %v746_v30 = vpack.c.bf16 %v378_v22, %v377_v21  ;;  %v347_v32 = vld [vmem:[#allocation4 + $0xa0] sm:$0xff] }
  0x4b   :  { %657 = vmatpush1.bf16.msra.mxu0 %v656_v47  ;;  %v362_v31 = vld [vmem:[#allocation4 + $0x118] sm:$0xff]  ;;  %v348_v33 = vld [vmem:[#allocation4 + $0xa8] sm:$0xff]  ;;  %v379_v34 = vld [vmem:[#allocation4 + $0x1a0] sm:$0xff]  ;;  %v716_v36 = vpack.c.bf16 %v330_v28, %v329_v27 }
  0x4c   :  { %701 = vmatpush1.bf16.msra.mxu1 %v700_v48  ;;  %659 = vmatprep.subr.bf16.mxu0 %v658_v49  ;;  %v380_v35 = vld [vmem:[#allocation4 + $0x1a8] sm:$0xff]  ;;  %v748_v37 = vpack.c.bf16 %v362_v31, %v361_v29  ;;  %v718_v38 = vpack.c.bf16 %v348_v33, %v347_v32  ;;  %v331_v39 = vld [vmem:[#allocation4 + $0x20] sm:$0xff]  ;;  %v349_v44 = vld [vmem:[#allocation4 + $0xb0] sm:$0xff] }
  0x4d   :  { %703 = vmatprep.subr.bf16.mxu1 %v702_v53  ;;  %v332_v40 = vld [vmem:[#allocation4 + $0x28] sm:$0xff]  ;;  %v363_v41 = vld [vmem:[#allocation4 + $0x120] sm:$0xff]  ;;  %v750_v42 = vpack.c.bf16 %v380_v35, %v379_v34  ;;  %v350_v45 = vld [vmem:[#allocation4 + $0xb8] sm:$0xff] }
  0x4e   :  { %v364_v43 = vld [vmem:[#allocation4 + $0x128] sm:$0xff]  ;;  %v381_v46 = vld [vmem:[#allocation4 + $0x1b0] sm:$0xff]  ;;  %v382_v47 = vld [vmem:[#allocation4 + $0x1b8] sm:$0xff]  ;;  %v720_v48 = vpack.c.bf16 %v332_v40, %v331_v39  ;;  %v722_v50 = vpack.c.bf16 %v350_v45, %v349_v44 }
  0x4f   :  { %661 = vmatpush1.bf16.msra.mxu0 %v660_v59  ;;  %v752_v49 = vpack.c.bf16 %v364_v43, %v363_v41  ;;  %v333_v51 = vld [vmem:[#allocation4 + $0x30] sm:$0xff]  ;;  %v334_v52 = vld [vmem:[#allocation4 + $0x38] sm:$0xff]  ;;  %v754_v54 = vpack.c.bf16 %v382_v47, %v381_v46  ;;  %v351_v56 = vld [vmem:[#allocation4 + $0xc0] sm:$0xff] }
  0x50   :  { %705 = vmatpush1.bf16.msra.mxu1 %v704_v60  ;;  %663 = vmatprep.subr.bf16.mxu0 %v662_v61  ;;  %v365_v53 = vld [vmem:[#allocation4 + $0x130] sm:$0xff]  ;;  %v366_v55 = vld [vmem:[#allocation4 + $0x138] sm:$0xff]  ;;  %v352_v57 = vld [vmem:[#allocation4 + $0xc8] sm:$0xff]  ;;  %v724_v60 = vpack.c.bf16 %v334_v52, %v333_v51 }
  0x51   :  { %707 = vmatprep.subr.bf16.mxu1 %v706_v0  ;;  %v383_v58 = vld [vmem:[#allocation4 + $0x1c0] sm:$0xff]  ;;  %v384_v59 = vld [vmem:[#allocation4 + $0x1c8] sm:$0xff]  ;;  %v756_v61 = vpack.c.bf16 %v366_v55, %v365_v53  ;;  %v726_v62 = vpack.c.bf16 %v352_v57, %v351_v56  ;;  %v386_v7 = vld [vmem:[#allocation4 + $0x1d8] sm:$0xff] }
  0x52   :  { %v335_v63 = vld [vmem:[#allocation4 + $0x40] sm:$0xff]  ;;  %v336_v0 = vld [vmem:[#allocation4 + $0x48] sm:$0xff]  ;;  %v758_v2 = vpack.c.bf16 %v384_v59, %v383_v58  ;;  %v337_v11 = vld [vmem:[#allocation4 + $0x50] sm:$0xff] }
  0x53   :  { %665 = vmatpush1.bf16.msra.mxu0 %v664_v3  ;;  %v367_v1 = vld [vmem:[#allocation4 + $0x140] sm:$0xff]  ;;  %v368_v3 = vld [vmem:[#allocation4 + $0x148] sm:$0xff]  ;;  %v369_v13 = vld [vmem:[#allocation4 + $0x150] sm:$0xff] }
  0x54   :  { %709 = vmatpush1.bf16.msra.mxu1 %v708_v4  ;;  %545 = vmatprep.subr.msk.mxu0 %vm168_vm1, %v139_v5  ;;  %v353_v4 = vld [vmem:[#allocation4 + $0xd0] sm:$0xff]  ;;  %v354_v5 = vld [vmem:[#allocation4 + $0xd8] sm:$0xff]  ;;  %v760_v9 = vpack.c.bf16 %v368_v3, %v367_v1  ;;  %v355_v16 = vld [vmem:[#allocation4 + $0xe0] sm:$0xff] }
  0x55   :  { %548 = vmatprep.subr.msk.mxu1 %vm168_vm1, %v141_v6  ;;  %v385_v6 = vld [vmem:[#allocation4 + $0x1d0] sm:$0xff]  ;;  %v730_v10 = vpack.c.bf16 %v354_v5, %v353_v4  ;;  %v370_v15 = vld [vmem:[#allocation4 + $0x158] sm:$0xff]  ;;  %v356_v17 = vld [vmem:[#allocation4 + $0xe8] sm:$0xff] }
  0x56   :  { %v762_v14 = vpack.c.bf16 %v386_v7, %v385_v6  ;;  %v387_v18 = vld [vmem:[#allocation4 + $0x1e0] sm:$0xff]  ;;  %v764_v21 = vpack.c.bf16 %v370_v15, %v369_v13  ;;  %v734_v22 = vpack.c.bf16 %v356_v17, %v355_v16  ;;  %v372_v28 = vld [vmem:[#allocation4 + $0x168] sm:$0xff]  ;;  %v358_v31 = vld [vmem:[#allocation4 + $0xf8] sm:$0xff] }
  0x57   :  { %546 = vmatpush1.msk.msra.mxu0 %vm168_vm1, %v138_v8  ;;  %v728_v8 = vpack.c.bf16 %v336_v0, %v335_v63  ;;  %v389_v32 = vld [vmem:[#allocation4 + $0x1f0] sm:$0xff]  ;;  %v390_v34 = vld [vmem:[#allocation4 + $0x1f8] sm:$0xff]  ;;  %v142_v45 = vld [vmem:[%s911_s2] sm:$0xf] }
  0x58   :  { %549 = vmatpush1.msk.msra.mxu1 %vm168_vm1, %v140_v12  ;;  %246 = vmatmul.mubr.f32.vlgmr.msra.gmra.mrb[0].mxu0 %v48_v19  ;;  %v338_v12 = vld [vmem:[#allocation4 + $0x58] sm:$0xff]  ;;  %v341_v35 = vld [vmem:[#allocation4 + $0x70] sm:$0xff]  ;;  %v551_v3 = vld [vmem:[%s913_s4] ss:$0 sm:$0xff] }
  0x59   :  { %317 = vmatmul.mubr.f32.vlgmr.msra.gmra.mrb[0].mxu1 %v48_v19  ;;  %711 = vmatprep.subr.bf16.mxu0 %v710_v20  ;;  %v388_v19 = vld [vmem:[#allocation4 + $0x1e8] sm:$0xff]  ;;  %v732_v20 = vpack.c.bf16 %v338_v12, %v337_v11  ;;  %v373_v39 = vld [vmem:[#allocation4 + $0x170] sm:$0xff]  ;;  %v374_v40 = vld [vmem:[#allocation4 + $0x178] sm:$0xff] }
  0x5a   :  { %743 = vmatprep.subr.bf16.mxu1 %v742_v23  ;;  %713 = vmatpush3.bf16.msra.mxu0 %v712_v24  ;;  %v766_v23 = vpack.c.bf16 %v388_v19, %v387_v18  ;;  %v339_v24 = vld [vmem:[#allocation4 + $0x60] sm:$0xff]  ;;  %v772_v41 = vpack.c.bf16 %v374_v40, %v373_v39 }
  0x5b   :  { %745 = vmatpush3.bf16.msra.mxu1 %v744_v25  ;;  %715 = vmatprep.subr.bf16.mxu0 %v714_v26  ;;  %v340_v25 = vld [vmem:[#allocation4 + $0x68] sm:$0xff]  ;;  %v371_v26 = vld [vmem:[#allocation4 + $0x160] sm:$0xff] }
  0x5c   :  { %747 = vmatprep.subr.bf16.mxu1 %v746_v30  ;;  %v736_v27 = vpack.c.bf16 %v340_v25, %v339_v24  ;;  %v768_v29 = vpack.c.bf16 %v372_v28, %v371_v26  ;;  %v357_v30 = vld [vmem:[#allocation4 + $0xf0] sm:$0xff] }
  0x5d   :  { %v738_v33 = vpack.c.bf16 %v358_v31, %v357_v30 }
  0x5e   :  { %717 = vmatpush3.bf16.msra.mxu0 %v716_v36  ;;  %v342_v36 = vld [vmem:[#allocation4 + $0x78] sm:$0xff] }
  0x5f   :  { %749 = vmatpush3.bf16.msra.mxu1 %v748_v37  ;;  %719 = vmatprep.subr.bf16.mxu0 %v718_v38  ;;  %v770_v37 = vpack.c.bf16 %v390_v34, %v389_v32  ;;  %v740_v38 = vpack.c.bf16 %v342_v36, %v341_v35 }
  0x60   :  { %751 = vmatprep.subr.bf16.mxu1 %v750_v42  ;;  %v144_v42 = vlaneseq }
  0x62   :  { %721 = vmatpush3.bf16.msra.mxu0 %v720_v48  ;;  %v145_v43 = vshrl.u32 %v144_v42, 7 }
  0x63   :  { %753 = vmatpush3.bf16.msra.mxu1 %v752_v49  ;;  %723 = vmatprep.subr.bf16.mxu0 %v722_v50 }
  0x64   :  { %755 = vmatprep.subr.bf16.mxu1 %v754_v54  ;;  %v146_v44 = vsub.s32 0, %v145_v43  ;;  %v154_v46 = vsub.s32 2, %v145_v43  ;;  %v150_v47 = vsub.s32 1, %v145_v43  ;;  %v158_v48 = vsub.s32 3, %v145_v43 }
  0x66   :  { %725 = vmatpush3.bf16.msra.mxu0 %v724_v60  ;;  %v147_v49 = vrot.slane %v142_v45, %v146_v44  ;;  %v155_v50 = vrot.slane %v142_v45, %v154_v46  ;;  %v151_v51 = vrot.slane %v142_v45, %v150_v47  ;;  %v159_v52 = vrot.slane %v142_v45, %v158_v48 }
  0x67   :  { %757 = vmatpush3.bf16.msra.mxu1 %v756_v61  ;;  %727 = vmatprep.subr.bf16.mxu0 %v726_v62 }
  0x68   :  { %759 = vmatprep.subr.bf16.mxu1 %v758_v2 }
  0x6a   :  { %729 = vmatpush3.bf16.msra.mxu0 %v728_v8 }
  0x6b   :  { %761 = vmatpush3.bf16.msra.mxu1 %v760_v9  ;;  %731 = vmatprep.subr.bf16.mxu0 %v730_v10 }
  0x6c   :  { %763 = vmatprep.subr.bf16.mxu1 %v762_v14 }
  0x6e   :  { %733 = vmatpush3.bf16.msra.mxu0 %v732_v20 }
  0x6f   :  { %765 = vmatpush3.bf16.msra.mxu1 %v764_v21  ;;  %735 = vmatprep.subr.bf16.mxu0 %v734_v22 }
  0x70   :  { %767 = vmatprep.subr.bf16.mxu1 %v766_v23 }
  0x72   :  { %737 = vmatpush3.bf16.msra.mxu0 %v736_v27 }
  0x73   :  { %769 = vmatpush3.bf16.msra.mxu1 %v768_v29  ;;  %739 = vmatprep.subr.bf16.mxu0 %v738_v33 }
  0x74   :  { %771 = vmatprep.subr.bf16.mxu1 %v770_v37 }
  0x76   :  { %741 = vmatpush3.bf16.msra.mxu0 %v740_v38 }
  0x77   :  { %773 = vmatpush3.bf16.msra.mxu1 %v772_v41 }
 0x12b   :  { %v247_v53 = vpop.f32.mrb[0].mxu0 }
 0x12c   :  { %v248_v54 = vadd.f32 %v247_v53, %v147_v49  ;;  %v318_v55 = vpop.f32.mrb[0].mxu1  ;;  %v249_v56 = vpop.f32.mrb[1].mxu0 }
 0x12d   :  { %v319_v57 = vadd.f32 %v318_v55, %v155_v50  ;;  %v250_v58 = vadd.f32 %v249_v56, %v151_v51  ;;  %v320_v59 = vpop.f32.mrb[1].mxu1 }
 0x12e   :  { %v321_v60 = vadd.f32 %v320_v59, %v159_v52  ;;  %v323_v63 = vmax.f32 %v248_v54, 0.0 }
 0x12f   :  { %v325_v61 = vmax.f32 %v319_v57, 0.0  ;;  %v324_v62 = vmax.f32 %v250_v58, 0.0 }
 0x130   :  { %v326_v0 = vmax.f32 %v321_v60, 0.0 }
 0x131   :  { %462 = vmatprep.mubr.f32.mxu0 %v324_v62 }
 0x132   :  { %532 = vmatprep.mubr.f32.mxu1 %v326_v0  ;;  %463 = vmatmul.mubr.f32.vlgmr.msra.gmra.mrb[2].mxu0 %v323_v63 }
 0x133   :  { %533 = vmatmul.mubr.f32.vlgmr.msra.gmra.mrb[2].mxu1 %v325_v61 }
 0x205   :  { %v584_v1 = vpop.f32.mrb[2].mxu0 }
 0x206   :  { %v619_v2 = vpop.f32.mrb[2].mxu1  ;;  %v585_v4 = vpop.f32.mrb[3].mxu0 }
 0x207   :  { %v586_v5 = vadd.f32 %v585_v4, %v584_v1  ;;  %v620_v6 = vpop.f32.mrb[3].mxu1 }
 0x208   :  { %v621_v7 = vadd.f32 %v620_v6, %v619_v2 }
 0x209   :  { %v465_v8 = vadd.f32 %v586_v5, %v551_v3 }
 0x20b   :  { %v535_v9 = vadd.f32 %v621_v7, %v465_v8 }
 0x20d   :  { %538 = vst [vmem:[%s914_s5] sm:$0xff] %v535_v9 }
 0x20e   :  { %543 = vsyncpa [#allocation3], 1 }
 0x20f   :  { %544 = vsyncpa [#allocation5], 1 }

</bundles_post_ra>
